<compile_context>
chip_gen: v7x
topology: tpu7x:2x2x1
jax: 0.10.0
libtpu: 0.0.40
codegen_flags: <defaults>
</compile_context>

<pallas_src>
import jax
import jax.numpy as jnp
from jax.experimental import pallas as pl
from jax.experimental.pallas import tpu as pltpu


def _round_up(x, m):
    return (x + m - 1) // m * m


_VMEM_LIMIT = 64 * 1024 * 1024   # explicit scoped-VMEM limit (all generations)
_TILE_BUDGET = 28 * 1024 * 1024  # keep per-step working set well under v7x's 64 MiB
_FUSE_FIN_MAX = 256              # fuse the projection when Fin_pad is this small


def _pick_node_tile(n, fin_pad, f_pad, cap=1024, budget=_TILE_BUDGET):
    """Largest 128-multiple divisor of round_up(n, 128), capped and VMEM-budgeted.

    Divisor-aware choice avoids pad blow-ups (e.g. N=600 -> N_pad=640, not 1024).
    """
    n_pad = _round_up(n, 128)
    best = 128
    t = 128
    while t <= min(cap, n_pad):
        if n_pad % t == 0:
            est = (2 * t * t * 4              # adj double-buffer
                   + 2 * t * fin_pad * 4      # text tiles (fused path)
                   + 2 * t * f_pad * 4        # hidden tiles (fallback path)
                   + 2 * t * f_pad * 4        # output tiles
                   + 2 * fin_pad * f_pad * 4  # resident weight
                   + t * f_pad * 4)           # f32 accumulator (fallback path)
            if est <= budget:
                best = t
        t += 128
    return best, n_pad


# ----------------------------------------------------------------------------
# Fused kernel: out = (adj @ (text @ W)) / (rowsum(adj) + 1) + bias
# f32 variant: accumulate directly into the resident output block (no acc scratch).
# ----------------------------------------------------------------------------
def gcn_fused_kernel_f32(adj_ref, text_ref, w_ref, bias_ref, out_ref, denom_ref):
    # adj_ref: (TM, TK)  text_ref: (TK, Fin_p)  w_ref: (Fin_p, F_p)
    # bias_ref: (1, F_p)  out_ref: (TM, F_p) f32  denom_ref: (TM, 1) f32 scratch
    k = pl.program_id(2)

    @pl.when(k == 0)
    def _init():
        out_ref[...] = jnp.zeros_like(out_ref)
        denom_ref[...] = jnp.zeros_like(denom_ref)

    adj = adj_ref[...]
    # Recompute the projection for this k-tile (cheap for small Fin); avoids the
    # hidden HBM round-trip of a separate projection pass.
    hid_k = jnp.dot(text_ref[...], w_ref[...], preferred_element_type=jnp.float32)
    out_ref[...] += jnp.dot(adj, hid_k, preferred_element_type=jnp.float32)
    denom_ref[...] += jnp.sum(adj, axis=1, keepdims=True)

    @pl.when(k == pl.num_programs(2) - 1)
    def _finalize():
        inv = pl.reciprocal(denom_ref[...] + 1.0, approx=False)
        out_ref[...] = out_ref[...] * inv + bias_ref[...]


# Non-f32 output variant: keep an f32 VMEM accumulator, cast once at the end.
def gcn_fused_kernel_acc(adj_ref, text_ref, w_ref, bias_ref, out_ref, acc_ref,
                         denom_ref):
    k = pl.program_id(2)

    @pl.when(k == 0)
    def _init():
        acc_ref[...] = jnp.zeros_like(acc_ref)
        denom_ref[...] = jnp.zeros_like(denom_ref)

    adj = adj_ref[...]
    hid_k = jnp.dot(text_ref[...], w_ref[...], preferred_element_type=jnp.float32)
    acc_ref[...] += jnp.dot(adj, hid_k, preferred_element_type=jnp.float32)
    denom_ref[...] += jnp.sum(adj, axis=1, keepdims=True)

    @pl.when(k == pl.num_programs(2) - 1)
    def _finalize():
        inv = pl.reciprocal(denom_ref[...] + 1.0, approx=False)
        out_ref[...] = (acc_ref[...] * inv
                        + bias_ref[...].astype(jnp.float32)).astype(out_ref.dtype)


# ----------------------------------------------------------------------------
# Fallback two-pass kernels for large Fin.
# ----------------------------------------------------------------------------
def gcn_proj_kernel(text_ref, w_ref, hid_ref):
    # text_ref: (TM, Fin_p)   w_ref: (Fin_p, F_p)   hid_ref: (TM, F_p)
    hid_ref[...] = jnp.dot(
        text_ref[...], w_ref[...], preferred_element_type=jnp.float32
    ).astype(hid_ref.dtype)


def gcn_agg_kernel(adj_ref, hid_ref, bias_ref, out_ref, acc_ref, denom_ref):
    # adj_ref: (TM, TK)  hid_ref: (TK, F_p)  bias_ref: (1, F_p)  out_ref: (TM, F_p)
    k = pl.program_id(2)

    @pl.when(k == 0)
    def _init():
        acc_ref[...] = jnp.zeros_like(acc_ref)
        denom_ref[...] = jnp.zeros_like(denom_ref)

    adj = adj_ref[...]
    acc_ref[...] += jnp.dot(adj, hid_ref[...], preferred_element_type=jnp.float32)
    denom_ref[...] += jnp.sum(adj, axis=1, keepdims=True)

    @pl.when(k == pl.num_programs(2) - 1)
    def _finalize():
        inv = pl.reciprocal(denom_ref[...] + 1.0, approx=False)
        out_ref[...] = (acc_ref[...] * inv
                        + bias_ref[...].astype(jnp.float32)).astype(out_ref.dtype)


# ----------------------------------------------------------------------------
# Wrapper
# ----------------------------------------------------------------------------
def gcn_forward(text, adj, weight, bias=None):
    """text: [B, N, Fin], adj: [B, N, N], weight: [Fin, Fout], bias: [Fout] or None."""
    B, N, Fin = text.shape
    Fout = weight.shape[1]
    dtype = text.dtype

    F_pad = _round_up(Fout, 128)
    Fin_pad = _round_up(Fin, 128)
    T, N_pad = _pick_node_tile(N, Fin_pad, F_pad)
    n_tiles = N_pad // T

    # Zero-padding is neutral for both matmuls and the degree sum; padded rows
    # reduce to bias and are sliced off at the end.
    text_p = jnp.pad(text, ((0, 0), (0, N_pad - N), (0, Fin_pad - Fin)))
    adj_p = jnp.pad(adj, ((0, 0), (0, N_pad - N), (0, N_pad - N)))
    w_p = jnp.pad(weight, ((0, Fin_pad - Fin), (0, F_pad - Fout))).astype(dtype)
    if bias is None:
        b_p = jnp.zeros((1, F_pad), dtype=dtype)
    else:
        b_p = jnp.pad(bias, (0, F_pad - Fout)).reshape(1, F_pad).astype(dtype)

    cp3 = pltpu.CompilerParams(
        dimension_semantics=("parallel", "parallel", "arbitrary"),
        vmem_limit_bytes=_VMEM_LIMIT,
    )

    if Fin_pad <= _FUSE_FIN_MAX:
        # ----- single fused pass (small Fin): no hidden HBM round-trip -------
        if dtype == jnp.float32:
            kernel = gcn_fused_kernel_f32
            scratch = [pltpu.VMEM((T, 1), jnp.float32)]
        else:
            kernel = gcn_fused_kernel_acc
            scratch = [pltpu.VMEM((T, F_pad), jnp.float32),
                       pltpu.VMEM((T, 1), jnp.float32)]

        out_p = pl.pallas_call(
            kernel,
            out_shape=jax.ShapeDtypeStruct((B, N_pad, F_pad), dtype),
            grid_spec=pltpu.PrefetchScalarGridSpec(
                num_scalar_prefetch=0,
                grid=(B, n_tiles, n_tiles),  # (batch, row tile, reduction tile)
                in_specs=[
                    pl.BlockSpec((pl.Squeezed(), T, T), lambda b, i, k: (b, i, k)),
                    pl.BlockSpec((pl.Squeezed(), T, Fin_pad),
                                 lambda b, i, k: (b, k, 0)),
                    pl.BlockSpec((Fin_pad, F_pad), lambda b, i, k: (0, 0)),
                    pl.BlockSpec((1, F_pad), lambda b, i, k: (0, 0)),
                ],
                out_specs=pl.BlockSpec((pl.Squeezed(), T, F_pad),
                                       lambda b, i, k: (b, i, 0)),
                scratch_shapes=scratch,
            ),
            compiler_params=cp3,
        )(adj_p, text_p, w_p, b_p)
        return out_p[:, :N, :Fout]

    # ----- fallback: two-pass (projection, then aggregation) for large Fin ----
    # TODO(synk): tile the projection over F_pad / Fin for very large weights on
    #             v7x (full weight block must stay well under 64 MiB VMEM).
    hidden = pl.pallas_call(
        gcn_proj_kernel,
        out_shape=jax.ShapeDtypeStruct((B, N_pad, F_pad), dtype),
        grid_spec=pltpu.PrefetchScalarGridSpec(
            num_scalar_prefetch=0,
            grid=(B, n_tiles),
            in_specs=[
                pl.BlockSpec((pl.Squeezed(), T, Fin_pad), lambda b, i: (b, i, 0)),
                pl.BlockSpec((Fin_pad, F_pad), lambda b, i: (0, 0)),
            ],
            out_specs=pl.BlockSpec((pl.Squeezed(), T, F_pad), lambda b, i: (b, i, 0)),
        ),
        compiler_params=pltpu.CompilerParams(
            dimension_semantics=("parallel", "parallel"),
            vmem_limit_bytes=_VMEM_LIMIT,
        ),
    )(text_p, w_p)

    out_p = pl.pallas_call(
        gcn_agg_kernel,
        out_shape=jax.ShapeDtypeStruct((B, N_pad, F_pad), dtype),
        grid_spec=pltpu.PrefetchScalarGridSpec(
            num_scalar_prefetch=0,
            grid=(B, n_tiles, n_tiles),
            in_specs=[
                pl.BlockSpec((pl.Squeezed(), T, T), lambda b, i, k: (b, i, k)),
                pl.BlockSpec((pl.Squeezed(), T, F_pad), lambda b, i, k: (b, k, 0)),
                pl.BlockSpec((1, F_pad), lambda b, i, k: (0, 0)),
            ],
            out_specs=pl.BlockSpec((pl.Squeezed(), T, F_pad),
                                   lambda b, i, k: (b, i, 0)),
            scratch_shapes=[
                pltpu.VMEM((T, F_pad), jnp.float32),
                pltpu.VMEM((T, 1), jnp.float32),
            ],
        ),
        compiler_params=cp3,
    )(adj_p, hidden, b_p)

    return out_p[:, :N, :Fout]


def gcn_reference(text, adj, weight, bias=None):
    hidden = jnp.matmul(text, weight)
    denom = jnp.sum(adj, axis=2, keepdims=True) + 1.0
    out = jnp.matmul(adj, hidden) / denom
    if bias is not None:
        out = out + bias
    return out


if __name__ == "__main__":
    # Case 1: module-sized toy shapes (fused path).
    k_text, k_adj, k_w, k_b = jax.random.split(jax.random.PRNGKey(0), 4)
    B, N, Fin, Fout = 2, 8, 32, 32
    text = jax.random.normal(k_text, (B, N, Fin), dtype=jnp.float32)
    adj = jax.random.uniform(k_adj, (B, N, N), dtype=jnp.float32)
    weight = jax.random.normal(k_w, (Fin, Fout), dtype=jnp.float32) * 0.1
    bias = jax.random.normal(k_b, (Fout,), dtype=jnp.float32) * 0.1

    out = gcn_forward(text, adj, weight, bias)
    jax.block_until_ready(out)
    ref = gcn_reference(text, adj, weight, bias)
    assert out.shape == (B, N, Fout)
    assert jnp.allclose(out, ref, atol=1e-4, rtol=1e-4), "mismatch vs reference (case 1)"

    # Case 2: unaligned shapes to exercise padding + slicing (fused path).
    k_text2, k_adj2, k_w2, k_b2 = jax.random.split(jax.random.PRNGKey(1), 4)
    B2, N2, Fin2, Fout2 = 2, 20, 12, 10
    text2 = jax.random.normal(k_text2, (B2, N2, Fin2), dtype=jnp.float32)
    adj2 = jax.random.uniform(k_adj2, (B2, N2, N2), dtype=jnp.float32)
    weight2 = jax.random.normal(k_w2, (Fin2, Fout2), dtype=jnp.float32) * 0.1
    bias2 = jax.random.normal(k_b2, (Fout2,), dtype=jnp.float32) * 0.1

    out2 = gcn_forward(text2, adj2, weight2, bias2)
    jax.block_until_ready(out2)
    ref2 = gcn_reference(text2, adj2, weight2, bias2)
    assert out2.shape == (B2, N2, Fout2)
    assert jnp.allclose(out2, ref2, atol=1e-4, rtol=1e-4), "mismatch vs reference (case 2)"

    # Case 3: large Fin to exercise the two-pass fallback path.
    k_text3, k_adj3, k_w3, k_b3 = jax.random.split(jax.random.PRNGKey(2), 4)
    B3, N3, Fin3, Fout3 = 2, 40, 300, 24
    text3 = jax.random.normal(k_text3, (B3, N3, Fin3), dtype=jnp.float32)
    adj3 = jax.random.uniform(k_adj3, (B3, N3, N3), dtype=jnp.float32)
    weight3 = jax.random.normal(k_w3, (Fin3, Fout3), dtype=jnp.float32) * 0.1
    bias3 = jax.random.normal(k_b3, (Fout3,), dtype=jnp.float32) * 0.1

    out3 = gcn_forward(text3, adj3, weight3, bias3)
    jax.block_until_ready(out3)
    ref3 = gcn_reference(text3, adj3, weight3, bias3)
    assert out3.shape == (B3, N3, Fout3)
    assert jnp.allclose(out3, ref3, atol=1e-3, rtol=1e-3), "mismatch vs reference (case 3)"

    print("KERNEL_OK")
</pallas_src>

<mosaic_0001>
module attributes {stable_mosaic.version = 11 : i64} {
  func.func @gcn_fused_kernel_f32(%arg0: i32, %arg1: i32, %arg2: i32, %arg3: memref<1x128x128xf32, #tpu.memory_space<vmem>>, %arg4: memref<1x128x128xf32, #tpu.memory_space<vmem>>, %arg5: memref<128x128xf32, #tpu.memory_space<vmem>>, %arg6: memref<1x128xf32, #tpu.memory_space<vmem>>, %arg7: memref<1x128x128xf32, #tpu.memory_space<vmem>>, %arg8: memref<128x1xf32, #tpu.memory_space<vmem>>) attributes {dimension_semantics = [#tpu.dimension_semantics<parallel>, #tpu.dimension_semantics<parallel>, #tpu.dimension_semantics<arbitrary>], iteration_bounds = array<i64: 2, 1, 1>, scalar_prefetch = 0 : i64, scratch_operands = 1 : i64, tpu.core_type = #tpu.core_type<tc>, window_params = [{transform_indices = @transform_0, window_bounds = array<i64: 1, 128, 128>}, {transform_indices = @transform_1, window_bounds = array<i64: 1, 128, 128>}, {pipeline_mode = #tpu.pipeline_mode<synchronous>, transform_indices = @transform_2, window_bounds = array<i64: 128, 128>}, {pipeline_mode = #tpu.pipeline_mode<synchronous>, transform_indices = @transform_3, window_bounds = array<i64: 1, 128>}, {transform_indices = @transform_4, window_bounds = array<i64: 1, 128, 128>}]} {
    %c0_i32 = arith.constant 0 : i32
    %0 = arith.cmpi eq, %arg2, %c0_i32 : i32
    %1 = arith.extui %0 : i1 to i32
    %c0_i32_0 = arith.constant 0 : i32
    %2 = arith.cmpi ne, %1, %c0_i32_0 : i32
    scf.if %2 {
      %cst_22 = arith.constant 0.000000e+00 : f32
      %24 = vector.broadcast %cst_22 : f32 to vector<128x128xf32>
      %c0_23 = arith.constant 0 : index
      %c0_24 = arith.constant 0 : index
      %c0_25 = arith.constant 0 : index
      %25 = vector.load %arg7[%c0_23, %c0_24, %c0_25] : memref<1x128x128xf32, #tpu.memory_space<vmem>>, vector<1x128x128xf32>
      %26 = vector.shape_cast %25 : vector<1x128x128xf32> to vector<128x128xf32>
      %27 = vector.shape_cast %24 : vector<128x128xf32> to vector<1x128x128xf32>
      tpu.vector_store %arg7[%c0_23, %c0_24, %c0_25], %27 {strides = array<i32>} : memref<1x128x128xf32, #tpu.memory_space<vmem>>, vector<1x128x128xf32>,
      %cst_26 = arith.constant 0.000000e+00 : f32
      %28 = vector.broadcast %cst_26 : f32 to vector<128x1xf32>
      %c0_27 = arith.constant 0 : index
      %c0_28 = arith.constant 0 : index
      %29 = vector.load %arg8[%c0_27, %c0_28] : memref<128x1xf32, #tpu.memory_space<vmem>>, vector<128x1xf32>
      tpu.vector_store %arg8[%c0_27, %c0_28], %28 {strides = array<i32>} : memref<128x1xf32, #tpu.memory_space<vmem>>, vector<128x1xf32>,
    } else {
    }
    %c0 = arith.constant 0 : index
    %c0_1 = arith.constant 0 : index
    %c0_2 = arith.constant 0 : index
    %3 = vector.load %arg3[%c0, %c0_1, %c0_2] : memref<1x128x128xf32, #tpu.memory_space<vmem>>, vector<1x128x128xf32>
    %4 = vector.shape_cast %3 : vector<1x128x128xf32> to vector<128x128xf32>
    %c0_3 = arith.constant 0 : index
    %c0_4 = arith.constant 0 : index
    %c0_5 = arith.constant 0 : index
    %5 = vector.load %arg4[%c0_3, %c0_4, %c0_5] : memref<1x128x128xf32, #tpu.memory_space<vmem>>, vector<1x128x128xf32>
    %6 = vector.shape_cast %5 : vector<1x128x128xf32> to vector<128x128xf32>
    %c0_6 = arith.constant 0 : index
    %c0_7 = arith.constant 0 : index
    %7 = vector.load %arg5[%c0_6, %c0_7] : memref<128x128xf32, #tpu.memory_space<vmem>>, vector<128x128xf32>
    %cst = arith.constant dense<0.000000e+00> : vector<128x128xf32>
    %8 = tpu.matmul %6, %7, %cst {dimension_numbers = #tpu.dot_dimension_numbers<[1], [0], [0], [1], [0, 0, 1, 1], [], []>} : vector<128x128xf32>, vector<128x128xf32>, vector<128x128xf32> -> vector<128x128xf32>
    %c0_8 = arith.constant 0 : index
    %c0_9 = arith.constant 0 : index
    %c0_10 = arith.constant 0 : index
    %9 = vector.load %arg7[%c0_8, %c0_9, %c0_10] : memref<1x128x128xf32, #tpu.memory_space<vmem>>, vector<1x128x128xf32>
    %10 = vector.shape_cast %9 : vector<1x128x128xf32> to vector<128x128xf32>
    %cst_11 = arith.constant dense<0.000000e+00> : vector<128x128xf32>
    %11 = tpu.matmul %4, %8, %cst_11 {dimension_numbers = #tpu.dot_dimension_numbers<[1], [0], [0], [1], [0, 0, 1, 1], [], []>} : vector<128x128xf32>, vector<128x128xf32>, vector<128x128xf32> -> vector<128x128xf32>
    %12 = arith.addf %10, %11 : vector<128x128xf32>
    %c0_12 = arith.constant 0 : index
    %c0_13 = arith.constant 0 : index
    %c0_14 = arith.constant 0 : index
    %13 = vector.load %arg7[%c0_12, %c0_13, %c0_14] : memref<1x128x128xf32, #tpu.memory_space<vmem>>, vector<1x128x128xf32>
    %14 = vector.shape_cast %13 : vector<1x128x128xf32> to vector<128x128xf32>
    %15 = vector.shape_cast %12 : vector<128x128xf32> to vector<1x128x128xf32>
    tpu.vector_store %arg7[%c0_12, %c0_13, %c0_14], %15 {strides = array<i32>} : memref<1x128x128xf32, #tpu.memory_space<vmem>>, vector<1x128x128xf32>,
    %c0_15 = arith.constant 0 : index
    %c0_16 = arith.constant 0 : index
    %16 = vector.load %arg8[%c0_15, %c0_16] : memref<128x1xf32, #tpu.memory_space<vmem>>, vector<128x1xf32>
    %cst_17 = arith.constant dense<0.000000e+00> : vector<128xf32>
    %17 = vector.multi_reduction <add>, %4, %cst_17 [1] : vector<128x128xf32> to vector<128xf32>
    %18 = vector.shape_cast %17 : vector<128xf32> to vector<128x1xf32>
    %19 = arith.addf %16, %18 : vector<128x1xf32>
    %c0_18 = arith.constant 0 : index
    %c0_19 = arith.constant 0 : index
    %20 = vector.load %arg8[%c0_18, %c0_19] : memref<128x1xf32, #tpu.memory_space<vmem>>, vector<128x1xf32>
    tpu.vector_store %arg8[%c0_18, %c0_19], %19 {strides = array<i32>} : memref<128x1xf32, #tpu.memory_space<vmem>>, vector<128x1xf32>,
    %c0_i32_20 = arith.constant 0 : i32
    %21 = arith.cmpi eq, %arg2, %c0_i32_20 : i32
    %22 = arith.extui %21 : i1 to i32
    %c0_i32_21 = arith.constant 0 : i32
    %23 = arith.cmpi ne, %22, %c0_i32_21 : i32
    scf.if %23 {
      %c0_22 = arith.constant 0 : index
      %c0_23 = arith.constant 0 : index
      %24 = vector.load %arg8[%c0_22, %c0_23] : memref<128x1xf32, #tpu.memory_space<vmem>>, vector<128x1xf32>
      %cst_24 = arith.constant 1.000000e+00 : f32
      %25 = vector.broadcast %cst_24 : f32 to vector<128x1xf32>
      %26 = arith.addf %24, %25 : vector<128x1xf32>
      %27 = tpu.reciprocal %26 : vector<128x1xf32> -> vector<128x1xf32>
      %c0_25 = arith.constant 0 : index
      %c0_26 = arith.constant 0 : index
      %c0_27 = arith.constant 0 : index
      %28 = vector.load %arg7[%c0_25, %c0_26, %c0_27] : memref<1x128x128xf32, #tpu.memory_space<vmem>>, vector<1x128x128xf32>
      %29 = vector.shape_cast %28 : vector<1x128x128xf32> to vector<128x128xf32>
      %30 = vector.broadcast %27 : vector<128x1xf32> to vector<128x128xf32>
      %31 = arith.mulf %29, %30 : vector<128x128xf32>
      %c0_28 = arith.constant 0 : index
      %c0_29 = arith.constant 0 : index
      %32 = vector.load %arg6[%c0_28, %c0_29] : memref<1x128xf32, #tpu.memory_space<vmem>>, vector<1x128xf32>
      %33 = vector.broadcast %32 : vector<1x128xf32> to vector<128x128xf32>
      %34 = arith.addf %31, %33 : vector<128x128xf32>
      %c0_30 = arith.constant 0 : index
      %c0_31 = arith.constant 0 : index
      %c0_32 = arith.constant 0 : index
      %35 = vector.load %arg7[%c0_30, %c0_31, %c0_32] : memref<1x128x128xf32, #tpu.memory_space<vmem>>, vector<1x128x128xf32>
      %36 = vector.shape_cast %35 : vector<1x128x128xf32> to vector<128x128xf32>
      %37 = vector.shape_cast %34 : vector<128x128xf32> to vector<1x128x128xf32>
      tpu.vector_store %arg7[%c0_30, %c0_31, %c0_32], %37 {strides = array<i32>} : memref<1x128x128xf32, #tpu.memory_space<vmem>>, vector<1x128x128xf32>,
    } else {
    }
    return
  }
  func.func @transform_0(%arg0: i32, %arg1: i32, %arg2: i32) -> (i32, i32, i32) {
    %c0_i32 = arith.constant 0 : i32
    return %arg0, %arg1, %arg2 : i32, i32, i32
  }
  func.func @transform_1(%arg0: i32, %arg1: i32, %arg2: i32) -> (i32, i32, i32) {
    %c0_i32 = arith.constant 0 : i32
    %c0_i32_0 = arith.constant 0 : i32
    return %arg0, %arg2, %c0_i32 : i32, i32, i32
  }
  func.func @transform_2(%arg0: i32, %arg1: i32, %arg2: i32) -> (i32, i32) {
    %c0_i32 = arith.constant 0 : i32
    %c0_i32_0 = arith.constant 0 : i32
    %c0_i32_1 = arith.constant 0 : i32
    return %c0_i32, %c0_i32_0 : i32, i32
  }
  func.func @transform_3(%arg0: i32, %arg1: i32, %arg2: i32) -> (i32, i32) {
    %c0_i32 = arith.constant 0 : i32
    %c0_i32_0 = arith.constant 0 : i32
    %c0_i32_1 = arith.constant 0 : i32
    return %c0_i32, %c0_i32_0 : i32, i32
  }
  func.func @transform_4(%arg0: i32, %arg1: i32, %arg2: i32) -> (i32, i32, i32) {
    %c0_i32 = arith.constant 0 : i32
    %c0_i32_0 = arith.constant 0 : i32
    return %arg0, %arg1, %c0_i32 : i32, i32, i32
  }
}

</mosaic_0001>

<bundles_post_ra>
// kernel: tpu_custom_call.1
= control target key start
LH: loop header
LB: loop body
LE: loop exit
PB: predicated region body
PF: predicated region fallthrough
CT: control target
= control target key end

     0   :  { %s2297_s0 = inlined_call_operand.hbm [shape: f32[2,128,128], index: 0, kind: input, shape index: {}]   ;;  %s2298_s1 = inlined_call_operand.hbm [shape: f32[2,128,128], index: 1, kind: input, shape index: {}]   ;;  %s2299_s2 = inlined_call_operand.hbm [shape: f32[128,128], index: 2, kind: input, shape index: {}]   ;;  %s2300_s3 = inlined_call_operand.hbm [shape: f32[1,128], index: 3, kind: input, shape index: {}]   ;;  %s2301_s4 = inlined_call_operand.hbm [shape: f32[2,128,128], index: 4, kind: output, shape index: {}]  }
   0x1   :  { %2311 = sst [smem:[#allocation19_spill]] %s2297_s0 }
   0x2   :  { %2312 = sst [smem:[#allocation20_spill]] %s2299_s2 }
   0x3   :  { %2313 = sst [smem:[#allocation21_spill]] %s2300_s3 }
   0x4   :  { %9 = vsyncpa [#allocation4], 0 }
   0x5   :  { %11 = vsyncpa [#allocation4 + $0x1], 0 }
   0x6   :  { %12 = vsyncpa [#allocation7], 0 }
   0x7   :  { %14 = vsyncpa [#allocation7 + $0x1], 0 }
   0x8   :  { %15 = vsyncpa [#allocation10], 0 }
   0x9   :  { %16 = vsyncpa [#allocation5], 0 }
   0xa   :  { %18 = vsyncpa [#allocation5 + $0x1], 0  ;;  %s1819_s15 = smov 0   ;;  %s1821_s16 = smov 0  }
   0xb   :  { %s1823_s17 = smov 0   ;;  %s1825_s18 = smov 0  }
   0xc   :  { %s1827_s19 = smov 0   ;;  %s1829_s20 = smov 0  }
   0xd LB: > { %2314 = sst [smem:[#allocation17_spill]] %s1777_s19  ;;  %s1850_s21 = sadd.s32 4294967295, %s1781_s20   ;;  %s1781_s20 = sphi %s1829_s20, %s24_s20   ;;  %s1777_s19 = sphi %s1827_s19, %s2337_s19   ;;  %s1773_s18 = sphi %s1825_s18, %s2336_s18   ;;  %s1769_s17 = sphi %s1823_s17, %s2340_s17   ;;  %s1765_s16 = sphi %s1821_s16, %s2339_s16   ;;  %s1761_s15 = sphi %s1819_s15, %s2338_s15  }
   0xe   : > { %s1177_s22 = sadd.s32 4294967294, %s1781_s20   ;;  %p67_p0 = scmp.ne.s32.totalorder %s1765_s16, %s1761_s15 }
   0xf   : > { %p2302_p1 = scmp.eq.s32.totalorder %s1850_s21, 0  ;;  %p169_p3 = scmp.eq.s32.totalorder %s1177_s22, 1 }
  0x10   : > { %p1178_p5 = scmp.ge.s32.totalorder %s1781_s20, 1  ;;  %p176_p7 = scmp.lt.s32.totalorder %s1781_s20, 3 }
  0x11   : > { %p1859_p4 = por %p2302_p1, %p67_p0  ;;  %p1864_p6 = por %p169_p3, %p67_p0 }
  0x12   : > { %p1869_p8 = pnand %p1178_p5, %p176_p7  ;;  %s1783_s26 = smov [#allocation8]  }
  0x13   : > { %s2315_s23 = scalar_select %p1859_p4, 1, 0 }
  0x14   : > { %s2316_s24 = scalar_select %p1864_p6, 1, 0 }
  0x15   : > { %s188_s27 = sshll.u32 %s1783_s26, 4  ;;  %p1457_p9 = pneg %p1869_p8  ;;  %s1873_s27 = int_to_ptr.vmem [resolvable:$true] %s188_s27 }
  0x16   : > { %s1784_s29 = smov [#allocation9]   ;;  %s2319_s2 = sld [smem:[#allocation20_spill]] }
  0x17   : > { %p1880_p11 = pnand %p1457_p9, %p2302_p1  ;;  %s202_s30 = sshll.u32 %s1784_s29, 4  ;;  %s1884_s30 = int_to_ptr.vmem [resolvable:$true] %s202_s30 }
  0x19   : > { %p1573_p13 = pneg %p1880_p11 }
  0x1c   : > { %s1571_s7 = scalar_lea.hbm %s2319_s2, 2048 }
  0x1d   : > { %p1572_p12 = scmp.ne.s32.totalorder %s2319_s2, %s1571_s7  ;;  %p1578_p5 = scmp.lt.u32.totalorder %s1571_s7, %s2319_s2 }
  0x1f   : > { %p1574_p0 = pnand %p1573_p13, %p1572_p12 }
  0x21   : > { %p1575_p3 = pneg %p1574_p0 }
  0x23   : > { %p1580_p7 = pnand %p1578_p5, %p1575_p3 }
  0x25   : > { %1583 = shalt.err (!%p1580_p7)
}
  0x26   : > { %s1584_s12 = scalar_lea.vmem %s1873_s27, 2048  ;;  %p1592_p2 = scmp.lt.s32.totalorder %s1873_s27, %s1873_s27 }
  0x27   : > { %p1585_p9 = scmp.ne.s32.totalorder %s1873_s27, %s1584_s12  ;;  %p1593_p12 = scmp.lt.s32.totalorder %s1584_s12, %s1584_s12 }
  0x29   : > { %p1587_p10 = pnand %p1585_p9, %p1573_p13  ;;  %p1594_p0 = por %p1593_p12, %p1592_p2 }
  0x2b   : > { %p1588_p1 = pneg %p1587_p10 }
  0x2d   : > { %p1595_p6 = pnand %p1594_p0, %p1588_p1 }
  0x2f   : > { %1598 = shalt.err (!%p1595_p6)
}
  0x30   : > { %s2303_s13 = smov 128   ;;  %s2305_s14 = smov 8  }
  0x31   : > { %1460 = dma.hbm_to_vmem [thread:$0]  (!%p1880_p11), %s2319_s2, 2048, %s1873_s27, [#allocation7], %s2303_s13, %s2303_s13, %s2305_s14  }
  0x32   : > { %s2320_s3 = sld [smem:[#allocation21_spill]] }
  0x38   : > { %s1599_s6 = scalar_lea.hbm %s2320_s3, 16 }
  0x39   : > { %p1600_p1 = scmp.ne.s32.totalorder %s2320_s3, %s1599_s6  ;;  %p1606_p10 = scmp.lt.u32.totalorder %s1599_s6, %s2320_s3 }
  0x3b   : > { %p1602_p2 = pnand %p1600_p1, %p1573_p13 }
  0x3d   : > { %p1603_p6 = pneg %p1602_p2 }
  0x3f   : > { %p1608_p3 = pnand %p1606_p10, %p1603_p6 }
  0x41   : > { %1611 = shalt.err (!%p1608_p3)
}
  0x42   : > { %s1612_s27 = scalar_lea.vmem %s1884_s30, 16  ;;  %s1619_s11 = scalar_lea.vmem %s1884_s30, 32 }
  0x43   : > { %p1613_p5 = scmp.ne.s32.totalorder %s1884_s30, %s1612_s27  ;;  %p1620_p12 = scmp.lt.s32.totalorder %s1884_s30, %s1884_s30 }
  0x44   : > { %p1621_p0 = scmp.lt.s32.totalorder %s1619_s11, %s1612_s27 }
  0x45   : > { %p1615_p7 = pnand %p1613_p5, %p1573_p13 }
  0x46   : > { %p1622_p1 = por %p1621_p0, %p1620_p12 }
  0x47   : > { %p1616_p9 = pneg %p1615_p7 }
  0x49   : > { %p1623_p2 = pnand %p1622_p1, %p1616_p9 }
  0x4b   : > { %1626 = shalt.err (!%p1623_p2)
}
  0x4c   : > { %1463 = dma.hbm_to_vmem [thread:$0]  (!%p1880_p11), %s2320_s3, 16, %s1884_s30, [#allocation10]  }
  0x4d   : > { %s43_s26 = sadd.s32 1, %s1777_s19  ;;  %s54_s29 = sadd.s32 1, %s1769_s17 }
  0x4e   : > { %p45_p13 = scmp.ge.s32.totalorder %s43_s26, 2  ;;  %p61_p6 = scmp.ne.s32.totalorder %s1769_s17, %s1765_s16 }
  0x4f   : > { %p62_p10 = scmp.eq.s32.totalorder %s1781_s20, 0  ;;  %p1477_p3 = scmp.lt.s32.totalorder %s1781_s20, 2 }
  0x50   : > { %s2342_s26 = smov (%p45_p13, %s43_s26), 0  ;;  %p2322_p7 = scmp.eq.s32.totalorder %s1850_s21, 1 }
  0x51   : > { %2321 = sst [smem:[#allocation18_spill]] %s2342_s26  ;;  %p63_p5 = por %p62_p10, %p61_p6 }
  0x52   : > { %p1952_p9 = por %p2322_p7, %p61_p6  ;;  %s47_s5 = ssub.s32 %s1777_s19, %s2342_s26 }
  0x53   : > { %s213_s6 = sand.u32 1, %s1769_s17   ;;  %p52_p12 = scmp.eq.s32.totalorder %s47_s5, 0 }
  0x54   : > { %s2323_s28 = scalar_select %p1952_p9, 1, 0 }
  0x55   : > { %s1959_s30 = sshll.u32 %s213_s6, 7  ;;  %s1200_s7 = sshll.u32 %s1777_s19, 11 }
  0x56   : > { %s1963_s8 = scalar_select %p52_p12, %s1769_s17, %s54_s29  }
  0x57   : > { %s2324_s0 = sld [smem:[#allocation19_spill]]  ;;  %s217_s11 = scalar_lea.vmem [#allocation3], %s1959_s30 }
  0x58   : > { %s227_s12 = sshll.u32 %s217_s11, 4  ;;  %p1973_p11 = pnand %p1477_p3, %p63_p5  ;;  %s1977_s12 = int_to_ptr.vmem [resolvable:$true] %s227_s12 }
  0x59   : > { %s1982_s9 = scalar_lea.hbm %s2298_s1, %s1200_s7  ;;  %s1984_s10 = scalar_lea.sflag [#allocation4], %s213_s6 }
  0x5a   : > { %p1629_p1 = pneg %p1973_p11 }
  0x5d   : > { %s1968_s27 = scalar_lea.hbm %s2324_s0, %s1200_s7  ;;  %s1632_s2 = scalar_lea.hbm %s2324_s0, 4096 }
  0x5e   : > { %s1627_s13 = scalar_lea.hbm %s1968_s27, 2048  ;;  %p1633_p6 = scmp.lt.u32.totalorder %s1968_s27, %s2324_s0 }
  0x5f   : > { %p1628_p0 = scmp.ne.s32.totalorder %s1968_s27, %s1627_s13  ;;  %p1634_p10 = scmp.lt.u32.totalorder %s1632_s2, %s1627_s13 }
  0x60   : > { %p1636_p5 = scmp.lt.u32.totalorder %s1627_s13, %s1968_s27 }
  0x61   : > { %p1630_p2 = pnand %p1629_p1, %p1628_p0  ;;  %p1635_p3 = por %p1634_p10, %p1633_p6 }
  0x63   : > { %p1631_p13 = pneg %p1630_p2  ;;  %p1637_p7 = por %p1636_p5, %p1635_p3 }
  0x65   : > { %p1638_p12 = pnand %p1637_p7, %p1631_p13 }
  0x67   : > { %1641 = shalt.err (!%p1638_p12)
}
  0x68   : > { %s1642_s6 = scalar_lea.vmem %s1977_s12, 2048  ;;  %s1787_s14 = smov [#allocation3]  }
  0x69   : > { %p1643_p0 = scmp.ne.s32.totalorder %s1977_s12, %s1642_s6  ;;  %s1647_s7 = sshll.u32 %s1787_s14, 4  ;;  %s1648_s7 = int_to_ptr.vmem [resolvable:$false] %s1647_s7 }
  0x6a   : > { %s1649_s3 = scalar_lea.vmem %s1648_s7, 4096  ;;  %p1650_p4 = scmp.lt.s32.totalorder %s1977_s12, %s1648_s7 }
  0x6b   : > { %p1645_p2 = pnand %p1643_p0, %p1629_p1  ;;  %p1651_p6 = scmp.lt.s32.totalorder %s1649_s3, %s1642_s6 }
  0x6d   : > { %p1646_p9 = pneg %p1645_p2  ;;  %p1652_p10 = por %p1651_p6, %p1650_p4 }
  0x6f   : > { %p1653_p3 = pnand %p1652_p10, %p1646_p9 }
  0x71   : > { %1656 = shalt.err (!%p1653_p3)
}
  0x72   : > { %s2326_s2 = smov 8   ;;  %s2327_s13 = smov 128  }
  0x73   : > { %1467 = dma.hbm_to_vmem [thread:$0]  (!%p1973_p11), %s1968_s27, 2048, %s1977_s12, %s1984_s10, %s2327_s13, %s2327_s13, %s2326_s2  }
  0x74   : > { %s241_s26 = scalar_lea.vmem [#allocation6], %s1959_s30  ;;  %s237_s5 = sand.u32 1, %s1781_s20  }
  0x75   : > { %s250_s29 = sshll.u32 %s241_s26, 4  ;;  %s2019_s11 = scalar_lea.sflag [#allocation7], %s237_s5  ;;  %s2017_s29 = int_to_ptr.vmem [resolvable:$true] %s250_s29 }
  0x76   : > { %s1657_s6 = scalar_lea.hbm %s1982_s9, 2048  ;;  %s1662_s3 = scalar_lea.hbm %s2298_s1, 4096 }
  0x77   : > { %p1658_p4 = scmp.ne.s32.totalorder %s1982_s9, %s1657_s6  ;;  %p1663_p5 = scmp.lt.u32.totalorder %s1982_s9, %s2298_s1 }
  0x78   : > { %p1664_p7 = scmp.lt.u32.totalorder %s1662_s3, %s1657_s6  ;;  %p1666_p0 = scmp.lt.u32.totalorder %s1657_s6, %s1982_s9 }
  0x79   : > { %p1660_p9 = pnand %p1658_p4, %p1629_p1 }
  0x7a   : > { %p1665_p12 = por %p1664_p7, %p1663_p5 }
  0x7b   : > { %p1661_p13 = pneg %p1660_p9 }
  0x7c   : > { %p1667_p2 = por %p1666_p0, %p1665_p12 }
  0x7e   : > { %p1668_p6 = pnand %p1667_p2, %p1661_p13 }
  0x80   : > { %1671 = shalt.err (!%p1668_p6)
}
  0x81   : > { %s1672_s30 = scalar_lea.vmem %s2017_s29, 2048  ;;  %s1788_s27 = smov [#allocation6]  }
  0x82   : > { %p1673_p10 = scmp.ne.s32.totalorder %s2017_s29, %s1672_s30  ;;  %s1677_s12 = sshll.u32 %s1788_s27, 4  ;;  %s1678_s12 = int_to_ptr.vmem [resolvable:$false] %s1677_s12 }
  0x83   : > { %s1679_s0 = scalar_lea.vmem %s1678_s12, 4096  ;;  %p1680_p9 = scmp.lt.s32.totalorder %s2017_s29, %s1678_s12 }
  0x84   : > { %p1675_p3 = pnand %p1673_p10, %p1629_p1  ;;  %p1681_p5 = scmp.lt.s32.totalorder %s1679_s0, %s1672_s30 }
  0x86   : > { %p1676_p4 = pneg %p1675_p3  ;;  %p1682_p7 = por %p1681_p5, %p1680_p9 }
  0x88   : > { %p1683_p12 = pnand %p1682_p7, %p1676_p4 }
  0x8a   : > { %1686 = shalt.err (!%p1683_p12)
}
  0x8b   : > { %1470 = dma.hbm_to_vmem [thread:$0]  (!%p1973_p11), %s1982_s9, 2048, %s2017_s29, %s2019_s11, %s2327_s13, %s2327_s13, %s2326_s2  }
  0x8c   : > { %262 = sbr.rel (%p1869_p8) target bundleno = 699 (0x2bb), region = 36  ;;  %s2051_s19 = sand.u32 (!%p1869_p8), 1, %s1765_s16  }
  0x8d   : > { %s2054_s10 = sshll.u32 (!%p1869_p8), %s2051_s19, 7  ;;  %s265_s22 = scalar_lea.sflag (!%p1869_p8), [#allocation4], %s2051_s19 }
  0x8e   : > { %s2058_s26 = scalar_lea.vmem (!%p1869_p8), [#allocation3], %s2054_s10  ;;  %p2328_p1 = scmp.ne.s32.totalorder (!%p1869_p8), %s2315_s23, 0 }
  0x93   : > { %1740 = dma.done.wait (%p2328_p1), %s265_s22, 2048  }
  0x94   : > { %1742 = vsyncadd (%p2328_p1), %s265_s22, 4294965248  ;;  %s273_s25 = sand.u32 1, %s1850_s21   ;;  %s2066_s2 = scalar_lea.vmem [#allocation6], %s2054_s10 }
  0x95   : > { %s274_s9 = scalar_lea.sflag [#allocation7], %s273_s25 }
  0x96   : > { %1744 = dma.done.wait (%p2328_p1), %s274_s9, 2048  }
  0x97   : > { %1746 = vsyncadd (%p2328_p1), %s274_s9, 4294965248  ;;  %p2329_p8 = scmp.eq.s32.totalorder %s1850_s21, 0 }
  0x99   : > { %1748 = dma.done.wait (%p2329_p8), [#allocation7], 2048   ;;  %p2330_p11 = pmov %p2329_p8 }
  0x9a   : > { %p2331_p13 = pmov %p2329_p8 }
  0x9b   : > { %1750 = vsyncadd (%p2330_p11), [#allocation7], 4294965248 }
  0x9c   : > { %1752 = dma.done.wait (%p2331_p13), [#allocation10], 16   ;;  %p2332_p0 = pmov %p2329_p8 }
  0x9d   : > { %v387_v0 = vld [vmem:[#allocation8] sm:$0xff]  ;;  %v388_v1 = vld [vmem:[#allocation8 + $0x8] sm:$0xff]  ;;  %v389_v2 = vld [vmem:[#allocation8 + $0x10] sm:$0xff]  ;;  %vm338_vm0 = vcmask 7168   ;;  %v1789_v56 = vmov 0.0   ;;  %s2209_s21 = scalar_lea.vmem [#allocation11], %s2054_s10 }
  0x9e   : > { %1754 = vsyncadd (%p2332_p0), [#allocation10], 4294967280  ;;  %v1379_v3 = vpack.c.bf16 %v388_v1, %v387_v0  ;;  %v390_v4 = vld [vmem:[#allocation8 + $0x18] sm:$0xff]  ;;  %v391_v6 = vld [vmem:[#allocation8 + $0x20] sm:$0xff]  ;;  %339 = vst.msk [vmem:[#allocation2] sm:$0xff] %vm338_vm0, %v1789_v56  ;;  %s1202_s23 = sshll.u32 %s1773_s18, 11 }
  0x9f   : > { %v1383_v5 = vpack.c.bf16 %v390_v4, %v389_v2  ;;  %v392_v7 = vld [vmem:[#allocation8 + $0x28] sm:$0xff]  ;;  %v371_v9 = vld [vmem:[%s2066_s2] sm:$0xff]  ;;  %v393_v10 = vld [vmem:[#allocation8 + $0x30] sm:$0xff]  ;;  %340 = vst.msk [vmem:[#allocation2 + $0x8] sm:$0xff] %vm338_vm0, %v1789_v56  ;;  %s1040_s13 = sshll.u32 %s2209_s21, 4  ;;  %s2243_s11 = scalar_lea.hbm %s2301_s4, %s1202_s23  ;;  %s2245_s13 = int_to_ptr.vmem [resolvable:$true] %s1040_s13 }
  0xa0   : > { %1380 = vmatprep.subr.bf16.mxu0 %v1379_v3  ;;  %v1387_v8 = vpack.c.bf16 %v392_v7, %v391_v6  ;;  %v394_v11 = vld [vmem:[#allocation8 + $0x38] sm:$0xff]  ;;  %1299 = vmatprep.mubr.f32.mxu0 %v371_v9  ;;  %v395_v13 = vld [vmem:[#allocation8 + $0x40] sm:$0xff]  ;;  %v396_v14 = vld [vmem:[#allocation8 + $0x48] sm:$0xff]  ;;  %341 = vst.msk [vmem:[#allocation2 + $0x10] sm:$0xff] %vm338_vm0, %v1789_v56  ;;  %s1025_s18 = scalar_lea.sflag [#allocation5], %s2051_s19  ;;  %s1687_s6 = scalar_lea.vmem %s2245_s13, 2048 }
  0xa1   : > { %1382 = vmatpush3.bf16.msra.mxu0 %v1379_v3  ;;  %v1391_v12 = vpack.c.bf16 %v394_v11, %v393_v10  ;;  %v355_v15 = vld [vmem:[%s2058_s26] sm:$0xff]  ;;  %v2083_v16 = vld [vmem:[%s2058_s26 + $0x10] sm:$0xff]  ;;  %v2086_v17 = vld [vmem:[%s2058_s26 + $0x8] sm:$0xff]  ;;  %v1395_v18 = vpack.c.bf16 %v396_v14, %v395_v13  ;;  %342 = vst.msk [vmem:[#allocation2 + $0x18] sm:$0xff] %vm338_vm0, %v1789_v56  ;;  %p1688_p2 = scmp.ne.s32.totalorder %s2245_s13, %s1687_s6  ;;  %p2333_p6 = scmp.ne.s32.totalorder %s2323_s28, 0 }
  0xa2   : > { %1384 = vmatprep.subr.bf16.mxu0 %v1383_v5  ;;  %757 = vadd.xlane.f32.xlu0 %v355_v15  ;;  %v2090_v19 = vld [vmem:[%s2058_s26 + $0x18] sm:$0xff]  ;;  %v397_v20 = vld [vmem:[#allocation8 + $0x50] sm:$0xff]  ;;  %v2095_v22 = vld [vmem:[%s2058_s26 + $0x20] sm:$0xff]  ;;  %343 = vst.msk [vmem:[#allocation2 + $0x20] sm:$0xff] %vm338_vm0, %v1789_v56  ;;  %s1791_s14 = smov [#allocation11]  }
  0xa3   : > { %1355 = vmatprep.mubr.f32.mxu1 %v355_v15  ;;  %761 = vadd.xlane.f32.xlu1 %v2083_v16  ;;  %v398_v21 = vld [vmem:[#allocation8 + $0x58] sm:$0xff]  ;;  %v2098_v24 = vld [vmem:[%s2058_s26 + $0x28] sm:$0xff]  ;;  %v399_v25 = vld [vmem:[#allocation8 + $0x60] sm:$0xff]  ;;  %344 = vst.msk [vmem:[#allocation2 + $0x28] sm:$0xff] %vm338_vm0, %v1789_v56  ;;  %p1689_p10 = pnand %p1688_p2, %p2333_p6  ;;  %s1691_s7 = sshll.u32 %s1791_s14, 4  ;;  %s1692_s7 = int_to_ptr.vmem [resolvable:$false] %s1691_s7 }
  0xa4   : > { %v1399_v23 = vpack.c.bf16 %v398_v21, %v397_v20  ;;  %v400_v26 = vld [vmem:[#allocation8 + $0x68] sm:$0xff]  ;;  %v2103_v27 = vld [vmem:[%s2058_s26 + $0x30] sm:$0xff]  ;;  %v2106_v29 = vld [vmem:[%s2058_s26 + $0x38] sm:$0xff]  ;;  %345 = vst.msk [vmem:[#allocation2 + $0x30] sm:$0xff] %vm338_vm0, %v1789_v56  ;;  %v1790_v21 = vmov 0   ;;  %s1693_s3 = scalar_lea.vmem %s1692_s7, 4096  ;;  %p1694_p4 = scmp.lt.s32.totalorder %s2245_s13, %s1692_s7 }
  0xa5   : > { %1386 = vmatpush3.bf16.msra.mxu0 %v1383_v5  ;;  %v1403_v28 = vpack.c.bf16 %v400_v26, %v399_v25  ;;  %v401_v30 = vld [vmem:[#allocation8 + $0x70] sm:$0xff]  ;;  %v402_v31 = vld [vmem:[#allocation8 + $0x78] sm:$0xff]  ;;  %v2111_v32 = vld [vmem:[%s2058_s26 + $0x40] sm:$0xff]  ;;  %346 = vst.msk [vmem:[#allocation2 + $0x38] sm:$0xff] %vm338_vm0, %v1789_v56  ;;  %1538 = vset.pattern.permute.xlu1 %v1790_v21  ;;  %p1690_p3 = pneg %p1689_p10  ;;  %p1695_p9 = scmp.lt.s32.totalorder %s1693_s3, %s1687_s6 }
  0xa6   : > { %1388 = vmatprep.subr.bf16.mxu0 %v1387_v8  ;;  %759 = vadd.xlane.f32.xlu0 %v2086_v17  ;;  %v1407_v33 = vpack.c.bf16 %v402_v31, %v401_v30  ;;  %v2114_v34 = vld [vmem:[%s2058_s26 + $0x48] sm:$0xff]  ;;  %v2118_v35 = vld [vmem:[%s2058_s26 + $0x50] sm:$0xff]  ;;  %v2122_v36 = vld [vmem:[%s2058_s26 + $0x58] sm:$0xff]  ;;  %347 = vst.msk [vmem:[#allocation2 + $0x40] sm:$0xff] %vm338_vm0, %v1789_v56 }
  0xa7   : > { %763 = vadd.xlane.f32.xlu1 %v2090_v19  ;;  %v372_v37 = vld [vmem:[%s2066_s2 + $0x8] sm:$0xff]  ;;  %v2127_v38 = vld [vmem:[%s2058_s26 + $0x60] sm:$0xff]  ;;  %v373_v39 = vld [vmem:[%s2066_s2 + $0x10] sm:$0xff]  ;;  %348 = vst.msk [vmem:[#allocation2 + $0x48] sm:$0xff] %vm338_vm0, %v1789_v56  ;;  %1537 = vset.pattern.permute.xlu0 %v1790_v21  ;;  %p1696_p5 = por %p1695_p9, %p1694_p4 }
  0xa8   : > { %v2132_v40 = vld [vmem:[%s2058_s26 + $0x68] sm:$0xff]  ;;  %v374_v41 = vld [vmem:[%s2066_s2 + $0x18] sm:$0xff]  ;;  %v2137_v42 = vld [vmem:[%s2058_s26 + $0x70] sm:$0xff]  ;;  %349 = vst.msk [vmem:[#allocation2 + $0x50] sm:$0xff] %vm338_vm0, %v1789_v56 }
  0xa9   : > { %1390 = vmatpush3.bf16.msra.mxu0 %v1387_v8  ;;  %v375_v43 = vld [vmem:[%s2066_s2 + $0x20] sm:$0xff]  ;;  %v2142_v44 = vld [vmem:[%s2058_s26 + $0x78] sm:$0xff]  ;;  %v376_v45 = vld [vmem:[%s2066_s2 + $0x28] sm:$0xff]  ;;  %350 = vst.msk [vmem:[#allocation2 + $0x58] sm:$0xff] %vm338_vm0, %v1789_v56  ;;  %p1697_p7 = pnand %p1696_p5, %p1690_p3 }
  0xaa   : > { %1392 = vmatprep.subr.bf16.mxu0 %v1391_v12  ;;  %765 = vadd.xlane.f32.xlu0 %v2095_v22  ;;  %v377_v46 = vld [vmem:[%s2066_s2 + $0x30] sm:$0xff]  ;;  %v378_v47 = vld [vmem:[%s2066_s2 + $0x38] sm:$0xff]  ;;  %v379_v48 = vld [vmem:[%s2066_s2 + $0x40] sm:$0xff]  ;;  %351 = vst.msk [vmem:[#allocation2 + $0x60] sm:$0xff] %vm338_vm0, %v1789_v56 }
  0xab   : > { %767 = vadd.xlane.f32.xlu1 %v2098_v24  ;;  %v380_v49 = vld [vmem:[%s2066_s2 + $0x48] sm:$0xff]  ;;  %v381_v50 = vld [vmem:[%s2066_s2 + $0x50] sm:$0xff]  ;;  %v382_v51 = vld [vmem:[%s2066_s2 + $0x58] sm:$0xff]  ;;  %352 = vst.msk [vmem:[#allocation2 + $0x68] sm:$0xff] %vm338_vm0, %v1789_v56 }
  0xac   : > { %v383_v52 = vld [vmem:[%s2066_s2 + $0x60] sm:$0xff]  ;;  %v384_v53 = vld [vmem:[%s2066_s2 + $0x68] sm:$0xff]  ;;  %v385_v54 = vld [vmem:[%s2066_s2 + $0x70] sm:$0xff]  ;;  %353 = vst.msk [vmem:[#allocation2 + $0x70] sm:$0xff] %vm338_vm0, %v1789_v56 }
  0xad   : > { %1394 = vmatpush3.bf16.msra.mxu0 %v1391_v12  ;;  %v386_v55 = vld [vmem:[%s2066_s2 + $0x78] sm:$0xff]  ;;  %354 = vst.msk [vmem:[#allocation2 + $0x78] sm:$0xff] %vm338_vm0, %v1789_v56  ;;  %v742_v59 = vld [vmem:[#allocation2 + $0x8] sm:$0xff]  ;;  %v741_v60 = vld [vmem:[#allocation2] sm:$0xff] }
  0xae   : > { %1396 = vmatprep.subr.bf16.mxu0 %v1395_v18  ;;  %769 = vadd.xlane.f32.xlu0 %v2103_v27  ;;  %v743_v0 = vld [vmem:[#allocation2 + $0x10] sm:$0xff]  ;;  %v744_v3 = vld [vmem:[#allocation2 + $0x18] sm:$0xff]  ;;  %v745_v8 = vld [vmem:[#allocation2 + $0x20] sm:$0xff] }
  0xaf   : > { %771 = vadd.xlane.f32.xlu1 %v2106_v29  ;;  %v746_v13 = vld [vmem:[#allocation2 + $0x28] sm:$0xff]  ;;  %v749_v26 = vld [vmem:[#allocation2 + $0x40] sm:$0xff] }
  0xb1   : > { %1398 = vmatpush3.bf16.msra.mxu0 %v1395_v18  ;;  %v747_v18 = vld [vmem:[#allocation2 + $0x30] sm:$0xff]  ;;  %v753_v56 = vld [vmem:[#allocation2 + $0x60] sm:$0xff] }
  0xb2   : > { %1400 = vmatprep.subr.bf16.mxu0 %v1399_v23  ;;  %773 = vadd.xlane.f32.xlu0 %v2111_v32 }
  0xb3   : > { %775 = vadd.xlane.f32.xlu1 %v2114_v34 }
  0xb5   : > { %1402 = vmatpush3.bf16.msra.mxu0 %v1399_v23  ;;  %v748_v23 = vld [vmem:[#allocation2 + $0x38] sm:$0xff] }
  0xb6   : > { %1404 = vmatprep.subr.bf16.mxu0 %v1403_v28  ;;  %777 = vadd.xlane.f32.xlu0 %v2118_v35 }
  0xb7   : > { %779 = vadd.xlane.f32.xlu1 %v2122_v36 }
  0xb9   : > { %1406 = vmatpush3.bf16.msra.mxu0 %v1403_v28 }
  0xba   : > { %1408 = vmatprep.subr.bf16.mxu0 %v1407_v33  ;;  %781 = vadd.xlane.f32.xlu0 %v2127_v38 }
  0xbb   : > { %783 = vadd.xlane.f32.xlu1 %v2132_v40 }
  0xbd   : > { %1410 = vmatpush3.bf16.msra.mxu0 %v1407_v33 }
  0xbe   : > { %785 = vadd.xlane.f32.xlu0 %v2137_v42 }
  0xbf   : > { %787 = vadd.xlane.f32.xlu1 %v2142_v44 }
  0xc0   : > { %1300 = vmatmul.mubr.f32.vlgmr.msra.gmra.mrb[0].mxu0 %v372_v37 }
  0xc1   : > { %1302 = vmatprep.mubr.f32.mxu0 %v373_v39 }
  0xc4   : > { %1303 = vmatmul.mubr.f32.gmra.mrb[2].mxu0 %v374_v41 }
  0xc5   : > { %1305 = vmatprep.mubr.f32.mxu0 %v375_v43 }
  0xc8   : > { %1306 = vmatmul.mubr.f32.gmra.mrb[4].mxu0 %v376_v45  ;;  %v750_v45 = vld [vmem:[#allocation2 + $0x48] sm:$0xff] }
  0xc9   : > { %1308 = vmatprep.mubr.f32.mxu0 %v377_v46 }
  0xcc   : > { %1309 = vmatmul.mubr.f32.gmra.mrb[6].mxu0 %v378_v47  ;;  %v751_v47 = vld [vmem:[#allocation2 + $0x50] sm:$0xff] }
  0xcd   : > { %1311 = vmatprep.mubr.f32.mxu0 %v379_v48 }
  0xd0   : > { %1312 = vmatmul.mubr.f32.gmra.mrb[8].mxu0 %v380_v49 }
  0xd1   : > { %1314 = vmatprep.mubr.f32.mxu0 %v381_v50 }
  0xd4   : > { %1315 = vmatmul.mubr.f32.gmra.mrb[10].mxu0 %v382_v51 }
  0xd5   : > { %1317 = vmatprep.mubr.f32.mxu0 %v383_v52 }
  0xd8   : > { %1318 = vmatmul.mubr.f32.gmra.mrb[12].mxu0 %v384_v53 }
  0xd9   : > { %1320 = vmatprep.mubr.f32.mxu0 %v385_v54  ;;  %v752_v54 = vld [vmem:[#allocation2 + $0x58] sm:$0xff] }
  0xdc   : > { %1321 = vmatmul.mubr.f32.gmra.mrb[14].mxu0 %v386_v55 }
 0x12f   : > { %v758_v57 = vpop.xlane.xlu0 %757 }
 0x130   : > { %v789_v62 = vadd.f32 %v758_v57, %v741_v60  ;;  %v762_v63 = vpop.xlane.xlu1 %761 }
 0x131   : > { %v791_v1 = vadd.f32 %v762_v63, %v743_v0 }
 0x132   : > { %806 = vst.msk [vmem:[#allocation2] sm:$0xff] %vm338_vm0, %v789_v62 }
 0x133   : > { %v760_v58 = vpop.xlane.xlu0 %759  ;;  %808 = vst.msk [vmem:[#allocation2 + $0x10] sm:$0xff] %vm338_vm0, %v791_v1  ;;  %v754_v1 = vld [vmem:[#allocation2 + $0x68] sm:$0xff] }
 0x134   : > { %v790_v61 = vadd.f32 %v760_v58, %v742_v59  ;;  %v764_v2 = vpop.xlane.xlu1 %763 }
 0x135   : > { %v792_v4 = vadd.f32 %v764_v2, %v744_v3  ;;  %v755_v3 = vld [vmem:[#allocation2 + $0x70] sm:$0xff] }
 0x136   : > { %807 = vst.msk [vmem:[#allocation2 + $0x8] sm:$0xff] %vm338_vm0, %v790_v61 }
 0x137   : > { %809 = vst.msk [vmem:[#allocation2 + $0x18] sm:$0xff] %vm338_vm0, %v792_v4  ;;  %v766_v7 = vpop.xlane.xlu0 %765 }
 0x138   : > { %v793_v9 = vadd.f32 %v766_v7, %v745_v8  ;;  %v768_v12 = vpop.xlane.xlu1 %767 }
 0x139   : > { %v794_v14 = vadd.f32 %v768_v12, %v746_v13  ;;  %v825_v31 = vld [vmem:[#allocation2] sm:$0xff] }
 0x13a   : > { %v827_v10 = vld [vmem:[#allocation2 + $0x10] sm:$0xff]  ;;  %810 = vst.msk [vmem:[#allocation2 + $0x20] sm:$0xff] %vm338_vm0, %v793_v9  ;;  %v841_v39 = vadd.f32 1.0, %v825_v31 }
 0x13b   : > { %v843_v11 = vadd.f32 1.0, %v827_v10  ;;  %v770_v15 = vpop.xlane.xlu0 %769  ;;  %811 = vst.msk [vmem:[#allocation2 + $0x28] sm:$0xff] %vm338_vm0, %v794_v14 }
 0x13c   : > { %v795_v20 = vadd.f32 %v770_v15, %v747_v18  ;;  %v772_v30 = vpop.xlane.xlu1 %771 }
 0x13d   : > { %v826_v5 = vld [vmem:[#allocation2 + $0x8] sm:$0xff]  ;;  %v796_v33 = vadd.f32 %v772_v30, %v748_v23 }
 0x13e   : > { %v842_v6 = vadd.f32 1.0, %v826_v5  ;;  %v828_v25 = vld [vmem:[#allocation2 + $0x18] sm:$0xff]  ;;  %812 = vst.msk [vmem:[#allocation2 + $0x30] sm:$0xff] %vm338_vm0, %v795_v20 }
 0x13f   : > { %v844_v28 = vadd.f32 1.0, %v828_v25  ;;  %v774_v37 = vpop.xlane.xlu0 %773  ;;  %813 = vst.msk [vmem:[#allocation2 + $0x38] sm:$0xff] %vm338_vm0, %v796_v33 }
 0x140   : > { %1539 = vrcp.f32 %v842_v6  ;;  %v797_v41 = vadd.f32 %v774_v37, %v749_v26  ;;  %v776_v49 = vpop.xlane.xlu1 %775 }
 0x141   : > { %1541 = vrcp.f32 %v843_v11  ;;  %v829_v43 = vld [vmem:[#allocation2 + $0x20] sm:$0xff]  ;;  %v798_v51 = vadd.f32 %v776_v49, %v750_v45  ;;  %v756_v11 = vld [vmem:[#allocation2 + $0x78] sm:$0xff] }
 0x142   : > { %1543 = vrcp.f32 %v844_v28  ;;  %v845_v48 = vadd.f32 1.0, %v829_v43  ;;  %814 = vst.msk [vmem:[#allocation2 + $0x40] sm:$0xff] %vm338_vm0, %v797_v41  ;;  %v830_v53 = vld [vmem:[#allocation2 + $0x28] sm:$0xff] }
 0x143   : > { %1545 = vrcp.f32 %v841_v39  ;;  %v778_v50 = vpop.xlane.xlu0 %777  ;;  %v846_v57 = vadd.f32 1.0, %v830_v53  ;;  %815 = vst.msk [vmem:[#allocation2 + $0x48] sm:$0xff] %vm338_vm0, %v798_v51 }
 0x144   : > { %1547 = vrcp.f32 %v845_v48  ;;  %v799_v52 = vadd.f32 %v778_v50, %v751_v47  ;;  %v780_v60 = vpop.xlane.xlu1 %779 }
 0x145   : > { %v831_v58 = vld [vmem:[#allocation2 + $0x30] sm:$0xff]  ;;  %1549 = vrcp.f32 %v846_v57  ;;  %v800_v62 = vadd.f32 %v780_v60, %v752_v54 }
 0x146   : > { %816 = vst.msk [vmem:[#allocation2 + $0x50] sm:$0xff] %vm338_vm0, %v799_v52  ;;  %v847_v59 = vadd.f32 1.0, %v831_v58  ;;  %v832_v0 = vld [vmem:[#allocation2 + $0x38] sm:$0xff] }
 0x147   : > { %v782_v61 = vpop.xlane.xlu0 %781  ;;  %v848_v4 = vadd.f32 1.0, %v832_v0  ;;  %817 = vst.msk [vmem:[#allocation2 + $0x58] sm:$0xff] %vm338_vm0, %v800_v62 }
 0x148   : > { %v801_v63 = vadd.f32 %v782_v61, %v753_v56  ;;  %1551 = vrcp.f32 %v847_v59  ;;  %v784_v6 = vpop.xlane.xlu1 %783 }
 0x149   : > { %v833_v5 = vld [vmem:[#allocation2 + $0x40] sm:$0xff]  ;;  %v802_v9 = vadd.f32 %v784_v6, %v754_v1  ;;  %1553 = vrcp.f32 %v848_v4 }
 0x14a   : > { %v1540_v46 = vpop.eup %1539  ;;  %818 = vst.msk [vmem:[#allocation2 + $0x60] sm:$0xff] %vm338_vm0, %v801_v63  ;;  %v834_v12 = vld [vmem:[#allocation2 + $0x48] sm:$0xff]  ;;  %v849_v14 = vadd.f32 1.0, %v833_v5 }
 0x14b   : > { %896 = vperm.xlu1 %1538, %v1540_v46   ;;  %v1542_v55 = vpop.eup %1541  ;;  %v786_v8 = vpop.xlane.xlu0 %785  ;;  %819 = vst.msk [vmem:[#allocation2 + $0x68] sm:$0xff] %vm338_vm0, %v802_v9  ;;  %v850_v15 = vadd.f32 1.0, %v834_v12 }
 0x14c   : > { %v1544_v2 = vpop.eup %1543  ;;  %v803_v10 = vadd.f32 %v786_v8, %v755_v3  ;;  %v788_v20 = vpop.xlane.xlu1 %787 }
 0x14d   : > { %v1546_v7 = vpop.eup %1545  ;;  %v835_v18 = vld [vmem:[#allocation2 + $0x50] sm:$0xff]  ;;  %v804_v21 = vadd.f32 %v788_v20, %v756_v11  ;;  %1555 = vrcp.f32 %v850_v15 }
 0x14e   : > { %891 = vperm.xlu0 %1537, %v1546_v7   ;;  %v1548_v13 = vpop.eup %1547  ;;  %820 = vst.msk [vmem:[#allocation2 + $0x70] sm:$0xff] %vm338_vm0, %v803_v10  ;;  %v836_v23 = vld [vmem:[#allocation2 + $0x58] sm:$0xff]  ;;  %1557 = vrcp.f32 %v849_v14  ;;  %v851_v26 = vadd.f32 1.0, %v835_v18 }
 0x14f   : > { %901 = vperm.xlu1 %1538, %v1542_v55   ;;  %v1550_v25 = vpop.eup %1549  ;;  %821 = vst.msk [vmem:[#allocation2 + $0x78] sm:$0xff] %vm338_vm0, %v804_v21  ;;  %v852_v28 = vadd.f32 1.0, %v836_v23 }
 0x151   : > { %v837_v30 = vld [vmem:[#allocation2 + $0x60] sm:$0xff]  ;;  %1559 = vrcp.f32 %v852_v28 }
 0x152   : > { %v1552_v31 = vpop.eup %1551  ;;  %v838_v33 = vld [vmem:[#allocation2 + $0x68] sm:$0xff]  ;;  %1561 = vrcp.f32 %v851_v26  ;;  %v853_v37 = vadd.f32 1.0, %v837_v30 }
 0x153   : > { %906 = vperm.xlu1 %1538, %v1544_v2   ;;  %v854_v39 = vadd.f32 1.0, %v838_v33  ;;  %v1554_v43 = vpop.eup %1553 }
 0x155   : > { %v839_v41 = vld [vmem:[#allocation2 + $0x70] sm:$0xff]  ;;  %1563 = vrcp.f32 %v854_v39 }
 0x156   : > { %v840_v45 = vld [vmem:[#allocation2 + $0x78] sm:$0xff]  ;;  %1565 = vrcp.f32 %v853_v37  ;;  %v855_v47 = vadd.f32 1.0, %v839_v41 }
 0x157   : > { %911 = vperm.xlu1 %1538, %v1548_v13   ;;  %v1556_v46 = vpop.eup %1555  ;;  %v856_v48 = vadd.f32 1.0, %v840_v45 }
 0x158   : > { %936 = vperm.xlu0 %1537, %v1556_v46   ;;  %v1558_v49 = vpop.eup %1557 }
 0x159   : > { %1567 = vrcp.f32 %v856_v48 }
 0x15a   : > { %1569 = vrcp.f32 %v855_v47 }
 0x15b   : > { %916 = vperm.xlu1 %1538, %v1550_v25   ;;  %v1560_v50 = vpop.eup %1559 }
 0x15c   : > { %946 = vperm.xlu0 %1537, %v1560_v50   ;;  %v1562_v51 = vpop.eup %1561 }
 0x15f   : > { %921 = vperm.xlu1 %1538, %v1552_v31   ;;  %v1564_v52 = vpop.eup %1563 }
 0x160   : > { %956 = vperm.xlu0 %1537, %v1564_v52   ;;  %v1566_v53 = vpop.eup %1565 }
 0x163   : > { %926 = vperm.xlu1 %1538, %v1554_v43   ;;  %v1568_v54 = vpop.eup %1567 }
 0x164   : > { %966 = vperm.xlu0 %1537, %v1568_v54   ;;  %v1570_v55 = vpop.eup %1569 }
 0x167   : > { %931 = vperm.xlu1 %1538, %v1558_v49  }
 0x16b   : > { %941 = vperm.xlu1 %1538, %v1562_v51  }
 0x16f   : > { %951 = vperm.xlu1 %1538, %v1566_v53  }
 0x173   : > { %961 = vperm.xlu1 %1538, %v1570_v55  }
 0x193   : > { %v1301_v56 = vpop.f32.mrb[0].mxu0 }
 0x194   : > { %v469_v57 = vpop.f32.mrb[1].mxu0 }
 0x195   : > { %v1411_v58 = vpack.c.bf16 %v1301_v56, %v469_v57 }
 0x197   : > { %v1304_v59 = vpop.f32.mrb[2].mxu0  ;;  %1412 = vmatprep.subr.bf16.mxu1 %v1411_v58 }
 0x198   : > { %v479_v60 = vpop.f32.mrb[3].mxu0  ;;  %1414 = vmatpush3.bf16.msra.mxu1 %v1411_v58 }
 0x199   : > { %v1415_v61 = vpack.c.bf16 %v1304_v59, %v479_v60 }
 0x19b   : > { %v1307_v62 = vpop.f32.mrb[4].mxu0  ;;  %1416 = vmatprep.subr.bf16.mxu1 %v1415_v61 }
 0x19c   : > { %v489_v63 = vpop.f32.mrb[5].mxu0  ;;  %1418 = vmatpush3.bf16.msra.mxu1 %v1415_v61 }
 0x19d   : > { %v1419_v0 = vpack.c.bf16 %v1307_v62, %v489_v63 }
 0x19f   : > { %v1310_v1 = vpop.f32.mrb[6].mxu0  ;;  %1420 = vmatprep.subr.bf16.mxu1 %v1419_v0 }
 0x1a0   : > { %v499_v2 = vpop.f32.mrb[7].mxu0  ;;  %1422 = vmatpush3.bf16.msra.mxu1 %v1419_v0 }
 0x1a1   : > { %v1423_v3 = vpack.c.bf16 %v1310_v1, %v499_v2 }
 0x1a3   : > { %v1313_v4 = vpop.f32.mrb[8].mxu0  ;;  %1424 = vmatprep.subr.bf16.mxu1 %v1423_v3 }
 0x1a4   : > { %v509_v5 = vpop.f32.mrb[9].mxu0  ;;  %1426 = vmatpush3.bf16.msra.mxu1 %v1423_v3 }
 0x1a5   : > { %v1427_v6 = vpack.c.bf16 %v1313_v4, %v509_v5 }
 0x1a7   : > { %v1316_v7 = vpop.f32.mrb[10].mxu0  ;;  %1428 = vmatprep.subr.bf16.mxu1 %v1427_v6 }
 0x1a8   : > { %v519_v8 = vpop.f32.mrb[11].mxu0  ;;  %1430 = vmatpush3.bf16.msra.mxu1 %v1427_v6 }
 0x1a9   : > { %v1431_v9 = vpack.c.bf16 %v1316_v7, %v519_v8 }
 0x1ab   : > { %v1319_v10 = vpop.f32.mrb[12].mxu0  ;;  %1432 = vmatprep.subr.bf16.mxu1 %v1431_v9 }
 0x1ac   : > { %v529_v11 = vpop.f32.mrb[13].mxu0  ;;  %1434 = vmatpush3.bf16.msra.mxu1 %v1431_v9 }
 0x1ad   : > { %v1435_v12 = vpack.c.bf16 %v1319_v10, %v529_v11 }
 0x1af   : > { %v1322_v13 = vpop.f32.mrb[14].mxu0  ;;  %1436 = vmatprep.subr.bf16.mxu1 %v1435_v12 }
 0x1b0   : > { %v539_v14 = vpop.f32.mrb[15].mxu0  ;;  %1438 = vmatpush3.bf16.msra.mxu1 %v1435_v12 }
 0x1b1   : > { %v1439_v15 = vpack.c.bf16 %v1322_v13, %v539_v14 }
 0x1b3   : > { %1440 = vmatprep.subr.bf16.mxu1 %v1439_v15 }
 0x1b4   : > { %1442 = vmatpush3.bf16.msra.mxu1 %v1439_v15 }
 0x1b7   : > { %1356 = vmatmul.mubr.f32.vlgmr.msra.gmra.mrb[0].mxu1 %v2086_v17 }
 0x1b8   : > { %1358 = vmatprep.mubr.f32.mxu1 %v2083_v16 }
 0x1bb   : > { %1359 = vmatmul.mubr.f32.gmra.mrb[2].mxu1 %v2090_v19 }
 0x1bc   : > { %1361 = vmatprep.mubr.f32.mxu1 %v2095_v22 }
 0x1bf   : > { %1362 = vmatmul.mubr.f32.gmra.mrb[4].mxu1 %v2098_v24 }
 0x1c0   : > { %1364 = vmatprep.mubr.f32.mxu1 %v2103_v27 }
 0x1c3   : > { %1365 = vmatmul.mubr.f32.gmra.mrb[6].mxu1 %v2106_v29 }
 0x1c4   : > { %1367 = vmatprep.mubr.f32.mxu1 %v2111_v32 }
 0x1c7   : > { %1368 = vmatmul.mubr.f32.gmra.mrb[8].mxu1 %v2114_v34  ;;  %v2204_v34 = vld [vmem:[#allocation9] ss:$0 sm:$0xff] }
 0x1c8   : > { %1370 = vmatprep.mubr.f32.mxu1 %v2118_v35 }
 0x1ca   : > { %v897_v16 = vpop.permute.xlu1 %896 }
 0x1cb   : > { %1371 = vmatmul.mubr.f32.gmra.mrb[10].mxu1 %v2122_v36 }
 0x1cc   : > { %1373 = vmatprep.mubr.f32.mxu1 %v2127_v38 }
 0x1cd   : > { %v892_v35 = vpop.permute.xlu0 %891 }
 0x1ce   : > { %v902_v17 = vpop.permute.xlu1 %901 }
 0x1cf   : > { %1374 = vmatmul.mubr.f32.gmra.mrb[12].mxu1 %v2132_v40 }
 0x1d0   : > { %1376 = vmatprep.mubr.f32.mxu1 %v2137_v42 }
 0x1d2   : > { %v907_v19 = vpop.permute.xlu1 %906 }
 0x1d3   : > { %1377 = vmatmul.mubr.f32.gmra.mrb[14].mxu1 %v2142_v44 }
 0x1d6   : > { %v912_v22 = vpop.permute.xlu1 %911 }
 0x1d7   : > { %v937_v37 = vpop.permute.xlu0 %936 }
 0x1da   : > { %v917_v24 = vpop.permute.xlu1 %916 }
 0x1db   : > { %v947_v53 = vpop.permute.xlu0 %946 }
 0x1de   : > { %v922_v29 = vpop.permute.xlu1 %921 }
 0x1df   : > { %v957_v62 = vpop.permute.xlu0 %956 }
 0x1e2   : > { %v927_v20 = vpop.permute.xlu1 %926 }
 0x1e3   : > { %v967_v10 = vpop.permute.xlu0 %966 }
 0x1e6   : > { %v932_v41 = vpop.permute.xlu1 %931 }
 0x1ea   : > { %v942_v54 = vpop.permute.xlu1 %941 }
 0x1ee   : > { %v952_v1 = vpop.permute.xlu1 %951 }
 0x1f2   : > { %v962_v12 = vpop.permute.xlu1 %961 }
 0x28a   : > { %v1357_v27 = vpop.f32.mrb[0].mxu1 }
 0x28b   : > { %v630_v32 = vpop.f32.mrb[1].mxu1  ;;  %v970_v36 = vmul.f32 %v1357_v27, %v897_v16 }
 0x28c   : > { %v969_v38 = vmul.f32 %v892_v35, %v630_v32 }
 0x28d   : > { %v993_v40 = vadd.f32 %v2204_v34, %v970_v36 }
 0x28e   : > { %v1360_v18 = vpop.f32.mrb[2].mxu1  ;;  %v992_v44 = vadd.f32 %v2204_v34, %v969_v38 }
 0x28f   : > { %v640_v42 = vpop.f32.mrb[3].mxu1  ;;  %1009 = vst [vmem:[%s2209_s21 + $0x8] sm:$0xff] %v993_v40  ;;  %v972_v21 = vmul.f32 %v1360_v18, %v907_v19 }
 0x290   : > { %1008 = vst [vmem:[%s2209_s21] sm:$0xff] %v992_v44  ;;  %v971_v23 = vmul.f32 %v902_v17, %v640_v42 }
 0x291   : > { %v995_v26 = vadd.f32 %v2204_v34, %v972_v21 }
 0x292   : > { %v1363_v25 = vpop.f32.mrb[4].mxu1  ;;  %v994_v30 = vadd.f32 %v2204_v34, %v971_v23 }
 0x293   : > { %v650_v28 = vpop.f32.mrb[5].mxu1  ;;  %1011 = vst [vmem:[%s2209_s21 + $0x18] sm:$0xff] %v995_v26  ;;  %v974_v31 = vmul.f32 %v1363_v25, %v917_v24 }
 0x294   : > { %1010 = vst [vmem:[%s2209_s21 + $0x10] sm:$0xff] %v994_v30  ;;  %v973_v33 = vmul.f32 %v912_v22, %v650_v28 }
 0x295   : > { %v997_v43 = vadd.f32 %v2204_v34, %v974_v31 }
 0x296   : > { %v1366_v39 = vpop.f32.mrb[6].mxu1  ;;  %v996_v46 = vadd.f32 %v2204_v34, %v973_v33 }
 0x297   : > { %v660_v45 = vpop.f32.mrb[7].mxu1  ;;  %1013 = vst [vmem:[%s2209_s21 + $0x28] sm:$0xff] %v997_v43  ;;  %v976_v47 = vmul.f32 %v1366_v39, %v927_v20 }
 0x298   : > { %1012 = vst [vmem:[%s2209_s21 + $0x20] sm:$0xff] %v996_v46  ;;  %v975_v48 = vmul.f32 %v922_v29, %v660_v45 }
 0x299   : > { %v999_v50 = vadd.f32 %v2204_v34, %v976_v47 }
 0x29a   : > { %v1369_v49 = vpop.f32.mrb[8].mxu1  ;;  %v998_v52 = vadd.f32 %v2204_v34, %v975_v48 }
 0x29b   : > { %v670_v51 = vpop.f32.mrb[9].mxu1  ;;  %1015 = vst [vmem:[%s2209_s21 + $0x38] sm:$0xff] %v999_v50  ;;  %v978_v55 = vmul.f32 %v1369_v49, %v937_v37 }
 0x29c   : > { %1014 = vst [vmem:[%s2209_s21 + $0x30] sm:$0xff] %v998_v52  ;;  %v977_v56 = vmul.f32 %v932_v41, %v670_v51 }
 0x29d   : > { %v1001_v58 = vadd.f32 %v2204_v34, %v978_v55 }
 0x29e   : > { %v1372_v57 = vpop.f32.mrb[10].mxu1  ;;  %v1000_v60 = vadd.f32 %v2204_v34, %v977_v56 }
 0x29f   : > { %v680_v59 = vpop.f32.mrb[11].mxu1  ;;  %1017 = vst [vmem:[%s2209_s21 + $0x48] sm:$0xff] %v1001_v58  ;;  %v980_v61 = vmul.f32 %v1372_v57, %v947_v53 }
 0x2a0   : > { %1016 = vst [vmem:[%s2209_s21 + $0x40] sm:$0xff] %v1000_v60  ;;  %v979_v63 = vmul.f32 %v942_v54, %v680_v59 }
 0x2a1   : > { %v1003_v2 = vadd.f32 %v2204_v34, %v980_v61 }
 0x2a2   : > { %v1375_v0 = vpop.f32.mrb[12].mxu1  ;;  %v1002_v4 = vadd.f32 %v2204_v34, %v979_v63 }
 0x2a3   : > { %v690_v3 = vpop.f32.mrb[13].mxu1  ;;  %1019 = vst [vmem:[%s2209_s21 + $0x58] sm:$0xff] %v1003_v2  ;;  %v982_v5 = vmul.f32 %v1375_v0, %v957_v62 }
 0x2a4   : > { %1018 = vst [vmem:[%s2209_s21 + $0x50] sm:$0xff] %v1002_v4  ;;  %v981_v6 = vmul.f32 %v952_v1, %v690_v3 }
 0x2a5   : > { %v1005_v8 = vadd.f32 %v2204_v34, %v982_v5 }
 0x2a6   : > { %v1378_v7 = vpop.f32.mrb[14].mxu1  ;;  %v1004_v11 = vadd.f32 %v2204_v34, %v981_v6 }
 0x2a7   : > { %v700_v9 = vpop.f32.mrb[15].mxu1  ;;  %1021 = vst [vmem:[%s2209_s21 + $0x68] sm:$0xff] %v1005_v8  ;;  %v984_v13 = vmul.f32 %v1378_v7, %v967_v10 }
 0x2a8   : > { %1020 = vst [vmem:[%s2209_s21 + $0x60] sm:$0xff] %v1004_v11  ;;  %v983_v14 = vmul.f32 %v962_v12, %v700_v9 }
 0x2a9   : > { %v1007_v15 = vadd.f32 %v2204_v34, %v984_v13 }
 0x2aa   : > { %v1006_v16 = vadd.f32 %v2204_v34, %v983_v14 }
 0x2ab   : > { %1023 = vst [vmem:[%s2209_s21 + $0x78] sm:$0xff] %v1007_v15 }
 0x2ac   : > { %1022 = vst [vmem:[%s2209_s21 + $0x70] sm:$0xff] %v1006_v16 }
 0x2ad   : > { %1700 = shalt.err (!%p1697_p7)
}
 0x2ae   : > { %s1701_s30 = scalar_lea.hbm %s2243_s11, 2048  ;;  %s1705_s0 = scalar_lea.hbm %s2301_s4, 4096 }
 0x2af   : > { %p1702_p12 = scmp.ne.s32.totalorder %s2243_s11, %s1701_s30  ;;  %p1706_p11 = scmp.lt.u32.totalorder %s2243_s11, %s2301_s4 }
 0x2b0   : > { %p1707_p13 = scmp.lt.u32.totalorder %s1705_s0, %s1701_s30  ;;  %p1709_p2 = scmp.lt.u32.totalorder %s1701_s30, %s2243_s11 }
 0x2b1   : > { %p1703_p1 = pnand %p1702_p12, %p2333_p6 }
 0x2b2   : > { %p1708_p0 = por %p1707_p13, %p1706_p11 }
 0x2b3   : > { %p1704_p8 = pneg %p1703_p1 }
 0x2b4   : > { %p1710_p10 = por %p1709_p2, %p1708_p0 }
 0x2b6   : > { %p1711_p3 = pnand %p1710_p10, %p1704_p8 }
 0x2b8   : > { %1714 = shalt.err (!%p1711_p3)
}
 0x2b9   : > { %s1792_s26 = smov 128   ;;  %s1793_s25 = smov 8  }
 0x2ba   : > { %1455 = dma.vmem_to_hbm [thread:$0]  (%p2333_p6), %s2245_s13, 2048, %s2243_s11, %s1025_s18, %s1792_s26, %s1792_s26, %s1793_s25  }
 0x2bb PF: > { %s1055_s9 = sand.u32 1, %s1761_s15   ;;  %p2334_p4 = scmp.ne.s32.totalorder %s2316_s24, 0 }
 0x2bc   : > { %p2335_p9 = scmp.ge.s32.totalorder %s1781_s20, 2  ;;  %s1056_s2 = scalar_lea.sflag [#allocation5], %s1055_s9 }
 0x2be   : > { %p1472_p5 = pnand %p2335_p9, %p2334_p4 }
 0x2c0   : > { %1756 = dma.done.wait (!%p1472_p5), %s1056_s2, 2048  }
 0x2c1   : > { %1758 = vsyncadd (!%p1472_p5), %s1056_s2, 4294965248  ;;  %s24_s20 = sadd.s32 1, %s1781_s20   ;;  %s2336_s18 = sld [smem:[#allocation17_spill]] }
 0x2c2   : > { %p21_p7 = scmp.ge.s32.totalorder %s24_s20, 4   ;;  %s2337_s19 = sld [smem:[#allocation18_spill]] }
 0x2c3   : > { %s2338_s15 = smov %s1765_s16  ;;  %s2339_s16 = smov %s1769_s17 }
 0x2c4   : > { %s2340_s17 = smov %s1963_s8  ;;  %23 = sbr.rel (!%p21_p7) target bundleno = 13 (0xd), region = 110 }
 0x2cb   :  { %1061 = vsyncpa [#allocation4], 1 }
 0x2cc   :  { %1063 = vsyncpa [#allocation4 + $0x1], 1 }
 0x2cd   :  { %1064 = vsyncpa [#allocation7], 1 }
 0x2ce   :  { %1066 = vsyncpa [#allocation7 + $0x1], 1 }
 0x2cf   :  { %1067 = vsyncpa [#allocation10], 1 }
 0x2d0   :  { %1068 = vsyncpa [#allocation5], 1 }
 0x2d1   :  { %1070 = vsyncpa [#allocation5 + $0x1], 1 }

</bundles_post_ra>
